<compile_context>
chip_gen: v6e
topology: v6e:2x2x1
jax: 0.10.0
libtpu: 0.0.40
codegen_flags: <defaults>
</compile_context>

<pallas_src>
import functools
import math

import jax
import jax.numpy as jnp
from jax.experimental import pallas as pl
from jax.experimental.pallas import tpu as pltpu

_MAX_BLOCK_ELEMS = 512 * 1024          # ~2 MiB of f32 per input block per grid step
_WIDTHS = (1024, 512, 256, 128)        # candidate lane-dense slab widths

# torch clamp(p, 1e-7, 1-1e-7): for |x| >= _A_CLAMP the reference entropy is constant.
_A_CLAMP = math.log((1.0 - 1e-7) / 1e-7)                                   # ~16.1181
_ENT_CLAMP = -(1e-7 * math.log(1e-7) + (1.0 - 1e-7) * math.log1p(-1e-7))   # ~+1.71e-6
_LN2 = math.log(2.0)


def _round_up(x, m):
    return ((x + m - 1) // m) * m


def _pick_width(total_n):
    """Largest lane-dense width dividing total_n, preferring a row count % 8 == 0."""
    divs = [w for w in _WIDTHS if total_n % w == 0]
    for w in divs:
        if (total_n // w) % 8 == 0:
            return w
    return divs[0]


def _entropy_elem(x):
    """Per-element entropy of clamp(sigmoid(x), 1e-7, 1-1e-7).

    entropy(x) = log(1+e) + |x|*e/(1+e) with e = exp(-|x|): one exp + one log + one
    divide.  The torch clamp is reproduced exactly with one compare + select.
    """
    xf = x.astype(jnp.float32)
    a = jnp.abs(xf)
    e = jnp.exp(-a)                     # in (0, 1]
    ope = 1.0 + e
    ent = jnp.log(ope) + (a * e) / ope
    return jnp.where(a > jnp.float32(_A_CLAMP), jnp.float32(_ENT_CLAMP), ent)


def _partial_entropy_kernel(x_ref, out_ref, *, rows, block_rows, width, n_blocks):
    """Per-grid-block partial entropy sums, folded to an (8, width) slab."""
    ent = _entropy_elem(x_ref[...])                    # (block_rows, width) f32
    groups = block_rows // 8

    def fold(v):
        # Sublane-group folding: pure VALU vreg adds, no cross-lane work.
        acc = v[0:8, :]
        for g in range(1, groups):
            acc = acc + v[g * 8:(g + 1) * 8, :]
        return acc

    if rows % block_rows == 0:
        # No partial block anywhere: unconditional fast path.
        out_ref[...] = fold(ent)
    else:
        i = pl.program_id(0)

        @pl.when(i != n_blocks - 1)
        def _():
            out_ref[...] = fold(ent)

        @pl.when(i == n_blocks - 1)
        def _():
            # Only the trailing block can extend past `rows`; zero those rows
            # (their VMEM contents are unspecified).
            row = (jax.lax.broadcasted_iota(jnp.int32, (block_rows, width), 0)
                   + i * block_rows)
            out_ref[...] = fold(jnp.where(row < rows, ent, 0.0))


def _neg_entropy_kernel(x_ref, o_ref):
    o_ref[...] = -_entropy_elem(x_ref[...])


def _slab_view(logits, total_n):
    """Lane-dense 2-D view of the logits.

    Zero-copy reshape when total_n % 128 == 0 (common case); otherwise pads with
    fewer than 128 zeros (pad count returned for the exact ln(2) correction).
    """
    if total_n % 128 == 0:
        width = _pick_width(total_n)
        rows = total_n // width
        return logits.reshape(rows, width), rows, width, 0
    # TODO(synk): rare non-128-multiple tail still pays one small pad copy.
    width = 128
    rows = pl.cdiv(total_n, width)
    pad = rows * width - total_n
    x2d = jnp.pad(logits.reshape(-1), (0, pad)).reshape(rows, width)
    return x2d, rows, width, pad


def max_entropy_loss_bce(logits, reduce="mean"):
    """Pallas implementation of MaxEntropyLossBCE.forward (target arg is unused)."""
    if reduce not in ("mean", "sum", "none"):
        raise ValueError("Invalid reduction method. Use 'mean' or 'sum'.")

    B, C = logits.shape[0], logits.shape[1]
    spatial = 1
    for d in logits.shape[2:]:
        spatial *= d
    total_n = B * C * spatial

    x2d, rows, width, pad = _slab_view(logits, total_n)
    block_rows = max(8, min(_round_up(rows, 8), _MAX_BLOCK_ELEMS // width))
    n_blocks = pl.cdiv(rows, block_rows)

    if reduce == "none":
        out = pl.pallas_call(
            _neg_entropy_kernel,
            out_shape=jax.ShapeDtypeStruct((rows, width), jnp.float32),
            grid_spec=pltpu.PrefetchScalarGridSpec(
                num_scalar_prefetch=0,
                grid=(n_blocks,),
                in_specs=[pl.BlockSpec((block_rows, width), lambda i: (i, 0))],
                out_specs=pl.BlockSpec((block_rows, width), lambda i: (i, 0)),
            ),
            compiler_params=pltpu.CompilerParams(
                dimension_semantics=("parallel",)),
        )(x2d)
        if pad:
            out = out.reshape(-1)[:total_n]
        return out.reshape(B, C, spatial)

    # ---- 'mean' / 'sum' reduction path: per-block partials, summed in the wrapper ----
    kernel = functools.partial(
        _partial_entropy_kernel,
        rows=rows, block_rows=block_rows, width=width, n_blocks=n_blocks)

    partials = pl.pallas_call(
        kernel,
        out_shape=jax.ShapeDtypeStruct((n_blocks * 8, width), jnp.float32),
        grid_spec=pltpu.PrefetchScalarGridSpec(
            num_scalar_prefetch=0,
            grid=(n_blocks,),
            in_specs=[pl.BlockSpec((block_rows, width), lambda i: (i, 0))],
            out_specs=pl.BlockSpec((8, width), lambda i: (i, 0)),
        ),
        compiler_params=pltpu.CompilerParams(
            dimension_semantics=("parallel",)),
    )(x2d)

    entropy_sum = jnp.sum(partials)
    if pad:
        # Each padded zero contributes exactly ln(2) of entropy; correct it out.
        entropy_sum = entropy_sum - jnp.float32(pad * _LN2)

    if reduce == "mean":
        return -(entropy_sum / jnp.float32(total_n))
    return -entropy_sum


def _reference(logits, reduce="mean"):
    """Pure-JAX reference mirroring the PyTorch module."""
    B, C = logits.shape[0], logits.shape[1]
    x = logits.reshape(B, C, -1).astype(jnp.float32)
    p = jnp.clip(jax.nn.sigmoid(x), 1e-7, 1.0 - 1e-7)
    stacked = jnp.stack([1.0 - p, p], axis=1)
    entropy = -jnp.sum(stacked * jnp.log(stacked), axis=1)
    if reduce == "mean":
        return -entropy.mean()
    if reduce == "sum":
        return -entropy.sum()
    return -entropy


if __name__ == "__main__":
    key = jax.random.PRNGKey(0)
    # MaxEntropyLossBCE has no parameters; only logits are needed.
    shapes = [
        (2, 4, 16, 16),   # multiple of 128: zero-copy, single full block
        (2, 4, 480),      # multiple of 128: trailing partial block + group folding
        (2, 4, 25),       # not a multiple of 128: small-pad fallback + ln(2) correction
    ]

    ok = True
    for idx, shape in enumerate(shapes):
        logits = jax.random.normal(jax.random.fold_in(key, idx), shape,
                                   dtype=jnp.float32) * 3.0
        for mode in ("mean", "sum", "none"):
            got = jax.block_until_ready(max_entropy_loss_bce(logits, reduce=mode))
            want = jax.block_until_ready(_reference(logits, reduce=mode))
            if not jnp.allclose(got, want, rtol=1e-5, atol=1e-5):
                ok = False
                diff = jnp.max(jnp.abs(jnp.asarray(got) - jnp.asarray(want)))
                print(f"MISMATCH shape={shape} mode={mode} max_abs_diff={diff}")

    if ok:
        print("KERNEL_OK")
</pallas_src>

<mosaic_0001>
module attributes {stable_mosaic.version = 11 : i64} {
  func.func @_partial_entropy_kernel(%arg0: i32, %arg1: memref<8x256xf32, #tpu.memory_space<vmem>>, %arg2: memref<8x256xf32, #tpu.memory_space<vmem>>) attributes {dimension_semantics = [#tpu.dimension_semantics<parallel>], iteration_bounds = array<i64: 1>, scalar_prefetch = 0 : i64, scratch_operands = 0 : i64, tpu.core_type = #tpu.core_type<tc>, window_params = [{transform_indices = @transform_0, window_bounds = array<i64: 8, 256>}, {transform_indices = @transform_1, window_bounds = array<i64: 8, 256>}]} {
    %c0 = arith.constant 0 : index
    %c0_0 = arith.constant 0 : index
    %0 = vector.load %arg1[%c0, %c0_0] : memref<8x256xf32, #tpu.memory_space<vmem>>, vector<8x256xf32>
    %1 = math.absf %0 : vector<8x256xf32>
    %cst = arith.constant 0.000000e+00 : f32
    %2 = vector.broadcast %cst : f32 to vector<8x256xf32>
    %3 = arith.subf %2, %1 : vector<8x256xf32>
    %4 = math.exp %3 : vector<8x256xf32>
    %cst_1 = arith.constant 1.000000e+00 : f32
    %5 = vector.broadcast %cst_1 : f32 to vector<8x256xf32>
    %6 = arith.addf %5, %4 : vector<8x256xf32>
    %7 = math.log %6 : vector<8x256xf32>
    %8 = arith.mulf %1, %4 : vector<8x256xf32>
    %9 = arith.divf %8, %6 : vector<8x256xf32>
    %10 = arith.addf %7, %9 : vector<8x256xf32>
    %cst_2 = arith.constant 16.1180954 : f32
    %11 = vector.broadcast %cst_2 : f32 to vector<8x256xf32>
    %12 = arith.cmpf ogt, %1, %11 : vector<8x256xf32>
    %cst_3 = arith.constant 1.71180955E-6 : f32
    %13 = vector.broadcast %cst_3 : f32 to vector<8x256xf32>
    %14 = arith.select %12, %13, %10 : vector<8x256xi1>, vector<8x256xf32>
    %c0_4 = arith.constant 0 : index
    %c0_5 = arith.constant 0 : index
    %15 = vector.load %arg2[%c0_4, %c0_5] : memref<8x256xf32, #tpu.memory_space<vmem>>, vector<8x256xf32>
    tpu.vector_store %arg2[%c0_4, %c0_5], %14 {strides = array<i32>} : memref<8x256xf32, #tpu.memory_space<vmem>>, vector<8x256xf32>,
    return
  }
  func.func @transform_0(%arg0: i32) -> (i32, i32) {
    %c0_i32 = arith.constant 0 : i32
    %c0_i32_0 = arith.constant 0 : i32
    return %arg0, %c0_i32 : i32, i32
  }
  func.func @transform_1(%arg0: i32) -> (i32, i32) {
    %c0_i32 = arith.constant 0 : i32
    %c0_i32_0 = arith.constant 0 : i32
    return %arg0, %c0_i32 : i32, i32
  }
}

</mosaic_0001>

<bundles_post_ra>
// kernel: tpu_custom_call.1
= control target key start
LH: loop header
LB: loop body
LE: loop exit
PB: predicated region body
PF: predicated region fallthrough
CT: control target
= control target key end

     0   :  { %6 = vsyncpa [#allocation3], 0  ;;  %s142_s0 = inlined_call_operand.hbm [shape: f32[8,256], index: 0, kind: input, shape index: {}]   ;;  %s143_s1 = inlined_call_operand.hbm [shape: f32[8,256], index: 1, kind: output, shape index: {}]  }
   0x1   :  { %7 = vsyncpa [#allocation4], 0  ;;  %s124_s6 = smov [#allocation2]  }
   0x2   :  { %s14_s7 = sshll.u32 %s124_s6, 4  ;;  %s15_s7 = int_to_ptr.vmem [resolvable:$true] %s14_s7 }
   0x3   :  { %s88_s8 = scalar_lea.vmem %s15_s7, 256  ;;  %p93_p1 = scmp.lt.s32.totalorder %s15_s7, %s15_s7 }
   0x4   :  { %p89_p0 = scmp.ne.s32.totalorder %s15_s7, %s88_s8  ;;  %p94_p2 = scmp.lt.s32.totalorder %s88_s8, %s88_s8 }
   0x6   :  { %p95_p3 = por %p94_p2, %p93_p1 }
   0x8   :  { %p96_p4 = pnand %p95_p3, %p89_p0 }
   0xa   :  { %99 = shalt.err (!%p96_p4)
}
   0xb   :  { %17 = dma.hbm_to_vmem [thread:$0]  %s142_s0, 256, %s15_s7, [#allocation3]  }
   0xc   :  { %120 = dma.done.wait [#allocation3], 256  }
   0xd   :  { %121 = vsyncadd [#allocation3], 4294967040  ;;  %v21_v0 = vld [vmem:[#allocation2] sm:$0xff]  ;;  %v22_v1 = vld [vmem:[#allocation2 + $0x8] sm:$0xff]  ;;  %s125_s0 = smov [#allocation5]  }
   0xe   :  { %v23_v2 = vand.u32 2147483647, %v21_v0  ;;  %v24_v3 = vand.u32 2147483647, %v22_v1  ;;  %s57_s11 = sshll.u32 %s125_s0, 4  ;;  %s58_s11 = int_to_ptr.vmem [resolvable:$true] %s57_s11 }
   0xf   :  { %s100_s12 = scalar_lea.vmem %s58_s11, 256  ;;  %p105_p6 = scmp.lt.s32.totalorder %s58_s11, %s58_s11 }
  0x10   :  { %v25_v4 = vsub.f32 0.0, %v23_v2  ;;  %v26_v5 = vsub.f32 0.0, %v24_v3  ;;  %vm45_vm0 = vcmp.gt.f32.partialorder %v23_v2, 16.118095  ;;  %vm46_vm1 = vcmp.gt.f32.partialorder %v24_v3, 16.118095  ;;  %p101_p5 = scmp.ne.s32.totalorder %s58_s11, %s100_s12  ;;  %p106_p7 = scmp.lt.s32.totalorder %s100_s12, %s100_s12 }
  0x12   :  { %v27_v6 = vmul.f32 1.442695, %v25_v4  ;;  %v29_v7 = vmul.f32 1.442695, %v26_v5  ;;  %p107_p8 = por %p106_p7, %p105_p6 }
  0x14   :  { %68 = vpow2.f32 %v27_v6  ;;  %p108_p9 = pnand %p107_p8, %p101_p5 }
  0x15   :  { %70 = vpow2.f32 %v29_v7 }
  0x21   :  { %v69_v8 = vpop.eup %68 }
  0x22   :  { %v71_v9 = vpop.eup %70  ;;  %v31_v10 = vadd.f32 1.0, %v69_v8  ;;  %v37_v12 = vmul.f32 %v69_v8, %v23_v2 }
  0x23   :  { %v32_v11 = vadd.f32 1.0, %v71_v9  ;;  %v38_v14 = vmul.f32 %v71_v9, %v24_v3 }
  0x24   :  { %72 = vlog2.f32 %v31_v10 }
  0x25   :  { %74 = vrcp.f32 %v31_v10 }
  0x26   :  { %76 = vlog2.f32 %v32_v11 }
  0x27   :  { %78 = vrcp.f32 %v32_v11 }
  0x31   :  { %v73_v13 = vpop.eup %72 }
  0x32   :  { %v75_v15 = vpop.eup %74  ;;  %v34_v16 = vmul.f32 0.6931472, %v73_v13 }
  0x33   :  { %v77_v17 = vpop.eup %76  ;;  %v40_v18 = vmul.f32 %v75_v15, %v37_v12 }
  0x34   :  { %v79_v19 = vpop.eup %78  ;;  %v36_v20 = vmul.f32 0.6931472, %v77_v17 }
  0x35   :  { %v43_v21 = vadd.f32 %v40_v18, %v34_v16  ;;  %v42_v22 = vmul.f32 %v79_v19, %v38_v14 }
  0x37   :  { %v47_v23 = vsel %vm45_vm0, 1.7118095e-06, %v43_v21  ;;  %v44_v24 = vadd.f32 %v42_v22, %v36_v20 }
  0x38   :  { %49 = vst [vmem:[#allocation5] sm:$0xff] %v47_v23 }
  0x39   :  { %v48_v25 = vsel %vm46_vm1, 1.7118095e-06, %v44_v24 }
  0x3a   :  { %50 = vst [vmem:[#allocation5 + $0x8] sm:$0xff] %v48_v25 }
  0x3b   :  { %111 = shalt.err (!%p108_p9)
}
  0x3c   :  { %60 = dma.vmem_to_hbm [thread:$0]  %s58_s11, 256, %s143_s1, [#allocation4]  }
  0x3d   :  { %122 = dma.done.wait [#allocation4], 256  }
  0x3e   :  { %123 = vsyncadd [#allocation4], 4294967040 }
  0x3f   :  { %64 = vsyncpa [#allocation3], 1 }
  0x40   :  { %65 = vsyncpa [#allocation4], 1 }

</bundles_post_ra>
